<compile_context>
chip_gen: v5e
topology: v5e:2x2
jax: 0.10.0
libtpu: 0.0.40
codegen_flags: <defaults>
</compile_context>

<pallas_src>
import functools

import jax
import jax.numpy as jnp
from jax.experimental import pallas as pl
from jax.experimental.pallas import tpu as pltpu


def _patch_merging_kernel(xe_ref, xo_ref, w_ref, sb_ref, o_ref, *,
                          rows, two_c, inv_4c, eps):
    # xe_ref: (TR, Ww, 2C)  even-H rows -> channels [x0 | x2] per output pixel
    # xo_ref: (TR, Ww, 2C)  odd-H  rows -> channels [x1 | x3]
    # w_ref : (2, 2C, N)    [0] = gamma_e * W_e, [1] = gamma_o * W_o   (x.dtype)
    # sb_ref: (2, 1, N)     [0] = colsum(gamma * W), [1] = beta @ W    (f32)
    # o_ref : (TR, Ww, N)
    # Leading-dims-only reshape (minor dim unchanged): free when Ww % 8 == 0.
    xe = xe_ref[...].reshape(rows, two_c)
    xo = xo_ref[...].reshape(rows, two_c)

    xe32 = xe.astype(jnp.float32)
    xo32 = xo.astype(jnp.float32)

    # LayerNorm statistics over the full 4C features (union of both halves).
    s1 = jnp.sum(xe32, axis=-1, keepdims=True) + jnp.sum(xo32, axis=-1, keepdims=True)
    s2 = (jnp.sum(xe32 * xe32, axis=-1, keepdims=True)
          + jnp.sum(xo32 * xo32, axis=-1, keepdims=True))
    mu = s1 * inv_4c
    # One-pass variance, clamped at 0 so cancellation error can never push
    # rsqrt(var + eps) into NaN territory.
    var = jnp.maximum(s2 * inv_4c - mu * mu, 0.0)
    rstd = jax.lax.rsqrt(var + eps)

    acc = jnp.dot(xe, w_ref[0], preferred_element_type=jnp.float32)
    acc = acc + jnp.dot(xo, w_ref[1], preferred_element_type=jnp.float32)

    ws = sb_ref[0]                        # (1, N) colsum(gamma * W)
    bo = sb_ref[1]                        # (1, N) beta @ W
    # Two broadcast passes over (rows, N); all (rows, 1) math hoisted above.
    shift = bo - (rstd * mu) * ws
    out = rstd * acc + shift
    o_ref[...] = out.astype(o_ref.dtype).reshape(o_ref.shape)


def _pick_block_row_pairs(num_rp, bytes_per_rp, target_bytes=4 << 20):
    """Largest divisor of num_rp whose streamed-input block stays <= ~4 MiB.

    Big blocks amortize the ~0.35 us per-grid-step overhead while leaving
    ample VMEM headroom on v7x (64 MiB physical).  Since neither the input nor
    the output BlockSpec tiles its two minor dims, *any* divisor is legal, so
    the fallback can never degenerate to a whole-array block (d=1 always
    exists).  Mildly prefers an even number of grid steps so v7x's two
    TensorCores get balanced work under dimension_semantics=("parallel",).
    """
    cap = max(1, min(num_rp, target_bytes // max(bytes_per_rp, 1)))
    divisors = [d for d in range(1, cap + 1) if num_rp % d == 0]
    best = max(divisors)
    even = [d for d in divisors if (num_rp // d) % 2 == 0]
    if even and 2 * max(even) >= best:
        best = max(even)
    return best


def patch_merging_2d(x, ln_gamma, ln_beta, reduction_weight, *,
                     eps=1e-5, block_row_pairs=None):
    """x: (B, H, W, C).  ln_gamma/ln_beta: (4C,).  reduction_weight: (2C, 4C)
    (PyTorch nn.Linear layout).  Returns (B, H//2, W//2, 2C)."""
    B, H, W, C = x.shape
    Hh, Ww = H // 2, W // 2
    if (H % 2) or (W % 2):
        # Module's SHAPE_FIX truncation (warning print omitted).
        # TODO(synk): for odd H/W this slice makes the reshape below a real HBM
        # copy; folding the truncation into the index_map would preserve the
        # single-pass property, left out since even shapes are the common case.
        x = x[:, : 2 * Hh, : 2 * Ww, :]
    N = reduction_weight.shape[0]
    assert reduction_weight.shape == (N, 4 * C)
    assert ln_gamma.shape == (4 * C,) and ln_beta.shape == (4 * C,)

    # Free view: (B*Hh, 2, Ww, 2C); dim 1 = H parity,
    # last dim = [W-even channels | W-odd channels].
    x3 = x.reshape(B * Hh, 2, Ww, 2 * C)

    # ---- fold LayerNorm affine + Linear into small resident weights ----------
    Wt = reduction_weight.T.astype(jnp.float32)          # (4C, N): y = ln(m) @ Wt
    g = ln_gamma.astype(jnp.float32)
    b = ln_beta.astype(jnp.float32)
    Wg = g[:, None] * Wt                                  # (4C, N)
    # torch channel order is [x0|x1|x2|x3]; even-H rows carry [x0|x2], odd [x1|x3].
    Wg_e = jnp.concatenate([Wg[0:C], Wg[2 * C:3 * C]], axis=0)      # (2C, N)
    Wg_o = jnp.concatenate([Wg[C:2 * C], Wg[3 * C:4 * C]], axis=0)  # (2C, N)
    # MXU-native dtype: weights match x (bf16 when x is bf16); f32 accumulation
    # is kept via preferred_element_type in the kernel.
    w_stack = jnp.stack([Wg_e, Wg_o]).astype(x.dtype)               # (2, 2C, N)
    # Column sums taken from the *cast* weights so mean-removal stays exact.
    wsum = jnp.sum(w_stack.astype(jnp.float32), axis=(0, 1))        # (N,)
    bout = b @ Wt                                                   # (N,)
    sb = jnp.stack([wsum, bout])[:, None, :].astype(jnp.float32)    # (2, 1, N)

    # ---- tiling over the fused (B*Hh) row-pair axis ---------------------------
    num_rp = B * Hh
    itemsize = x.dtype.itemsize
    bytes_per_rp = 2 * Ww * 2 * C * itemsize
    if block_row_pairs is None:
        block_row_pairs = _pick_block_row_pairs(num_rp, bytes_per_rp)
    TR = block_row_pairs
    assert num_rp % TR == 0, (num_rp, TR)
    steps = num_rp // TR
    rows = TR * Ww

    # Scoped-VMEM budget: double-buffered streamed blocks + f32 temporaries +
    # resident weights.  Defaults are 16 MiB (v5e) / 32 MiB (v6e/v7x); raise to
    # fit the larger blocks, but stay well under v7x's 64 MiB physical VMEM.
    in_block = rows * 4 * C * itemsize              # xe + xo blocks combined
    out_block = rows * N * itemsize
    f32_tmp = rows * 2 * N * 4 + (rows * 4 * C * 4 if itemsize < 4 else 0)
    resident = 2 * (w_stack.size * w_stack.dtype.itemsize + sb.size * 4)
    needed = 2 * in_block + 2 * out_block + f32_tmp + resident + (2 << 20)
    vmem_limit = int(min(max(needed, 32 << 20), 48 << 20))

    total_rows = num_rp * Ww
    cost = pl.CostEstimate(
        flops=2 * total_rows * (4 * C) * N,
        transcendentals=total_rows,
        bytes_accessed=(x3.size * itemsize + total_rows * N * itemsize
                        + w_stack.size * w_stack.dtype.itemsize + sb.size * 4),
    )

    kernel = functools.partial(_patch_merging_kernel, rows=rows, two_c=2 * C,
                               inv_4c=1.0 / (4 * C), eps=eps)

    out3 = pl.pallas_call(
        kernel,
        out_shape=jax.ShapeDtypeStruct((num_rp, Ww, N), x.dtype),
        grid=(steps,),
        in_specs=[
            # The DMA performs the parity de-interleave: even-H rows ...
            pl.BlockSpec((TR, None, Ww, 2 * C), lambda i: (i, 0, 0, 0)),
            # ... and odd-H rows go to separate contiguous VMEM buffers.
            pl.BlockSpec((TR, None, Ww, 2 * C), lambda i: (i, 1, 0, 0)),
            # Grid-invariant (resident) folded weights and sums/bias.
            # TODO(synk): pipeline_mode=pl.Buffered(1) would drop their second
            # buffer; omitted to keep lowering robust across jax versions.
            pl.BlockSpec((2, 2 * C, N), lambda i: (0, 0, 0)),
            pl.BlockSpec((2, 1, N), lambda i: (0, 0, 0)),
        ],
        out_specs=pl.BlockSpec((TR, Ww, N), lambda i: (i, 0, 0)),
        compiler_params=pltpu.CompilerParams(
            dimension_semantics=("parallel",),
            vmem_limit_bytes=vmem_limit),
        cost_estimate=cost,
    )(x3, x3, w_stack, sb)
    # TODO(synk): for N < 128 the output store is still lane-sparse; packing
    # adjacent rows into a (rows/2, 2N) block (same HBM bytes) needs an
    # in-kernel sublane->lane reshape whose Mosaic lowering is not guaranteed,
    # so it is deliberately left out in favour of compile robustness.

    return out3.reshape(B, Hh, Ww, N)


if __name__ == "__main__":
    # Small shapes consistent with the module: dim=32 -> LayerNorm(128), Linear(128->64).
    B, H, W, dim = 2, 16, 16, 32

    key = jax.random.PRNGKey(0)
    kx, kw, kg, kb = jax.random.split(key, 4)
    x = jax.random.normal(kx, (B, H, W, dim), dtype=jnp.float32)
    reduction_weight = jax.random.normal(kw, (2 * dim, 4 * dim), dtype=jnp.float32) * 0.02
    ln_gamma = 1.0 + 0.1 * jax.random.normal(kg, (4 * dim,), dtype=jnp.float32)
    ln_beta = 0.1 * jax.random.normal(kb, (4 * dim,), dtype=jnp.float32)

    # block_row_pairs=4 -> 4 grid steps at this toy size (exercises the pipeline).
    out = patch_merging_2d(x, ln_gamma, ln_beta, reduction_weight, block_row_pairs=4)
    out = jax.block_until_ready(out)

    # Plain-JAX reference mirroring the PyTorch forward exactly.
    x0 = x[:, 0::2, 0::2, :]
    x1 = x[:, 1::2, 0::2, :]
    x2 = x[:, 0::2, 1::2, :]
    x3 = x[:, 1::2, 1::2, :]
    m = jnp.concatenate([x0, x1, x2, x3], axis=-1)              # (B, H/2, W/2, 4C)
    mu = m.mean(axis=-1, keepdims=True)
    var = ((m - mu) ** 2).mean(axis=-1, keepdims=True)
    y = (m - mu) / jnp.sqrt(var + 1e-5) * ln_gamma + ln_beta
    ref = y @ reduction_weight.T                                # (B, H/2, W/2, 2C)

    assert out.shape == (B, H // 2, W // 2, 2 * dim), out.shape
    err = float(jnp.max(jnp.abs(out - ref)))
    assert jnp.allclose(out, ref, atol=5e-3, rtol=1e-2), f"max abs err {err}"

    # Also exercise the automatic block picker (larger block, even step count).
    out2 = jax.block_until_ready(
        patch_merging_2d(x, ln_gamma, ln_beta, reduction_weight))
    assert jnp.allclose(out2, ref, atol=5e-3, rtol=1e-2)

    print("KERNEL_OK")
</pallas_src>

<mosaic_0001>
module attributes {stable_mosaic.version = 11 : i64} {
  func.func @_patch_merging_kernel(%arg0: i32, %arg1: memref<4x1x8x64xf32, #tpu.memory_space<vmem>>, %arg2: memref<4x1x8x64xf32, #tpu.memory_space<vmem>>, %arg3: memref<2x64x64xf32, #tpu.memory_space<vmem>>, %arg4: memref<2x1x64xf32, #tpu.memory_space<vmem>>, %arg5: memref<4x8x64xf32, #tpu.memory_space<vmem>>) attributes {dimension_semantics = [#tpu.dimension_semantics<parallel>], iteration_bounds = array<i64: 4>, scalar_prefetch = 0 : i64, scratch_operands = 0 : i64, tpu.core_type = #tpu.core_type<tc>, window_params = [{transform_indices = @transform_0, window_bounds = array<i64: 4, 1, 8, 64>}, {transform_indices = @transform_1, window_bounds = array<i64: 4, 1, 8, 64>}, {pipeline_mode = #tpu.pipeline_mode<synchronous>, transform_indices = @transform_2, window_bounds = array<i64: 2, 64, 64>}, {pipeline_mode = #tpu.pipeline_mode<synchronous>, transform_indices = @transform_3, window_bounds = array<i64: 2, 1, 64>}, {transform_indices = @transform_4, window_bounds = array<i64: 4, 8, 64>}]} {
    %c0 = arith.constant 0 : index
    %c0_0 = arith.constant 0 : index
    %c0_1 = arith.constant 0 : index
    %c0_2 = arith.constant 0 : index
    %0 = vector.load %arg1[%c0, %c0_0, %c0_1, %c0_2] : memref<4x1x8x64xf32, #tpu.memory_space<vmem>>, vector<4x1x8x64xf32>
    %1 = vector.shape_cast %0 : vector<4x1x8x64xf32> to vector<4x8x64xf32>
    %2 = vector.shape_cast %1 : vector<4x8x64xf32> to vector<32x64xf32>
    %c0_3 = arith.constant 0 : index
    %c0_4 = arith.constant 0 : index
    %c0_5 = arith.constant 0 : index
    %c0_6 = arith.constant 0 : index
    %3 = vector.load %arg2[%c0_3, %c0_4, %c0_5, %c0_6] : memref<4x1x8x64xf32, #tpu.memory_space<vmem>>, vector<4x1x8x64xf32>
    %4 = vector.shape_cast %3 : vector<4x1x8x64xf32> to vector<4x8x64xf32>
    %5 = vector.shape_cast %4 : vector<4x8x64xf32> to vector<32x64xf32>
    %cst = arith.constant dense<0.000000e+00> : vector<32xf32>
    %6 = vector.multi_reduction <add>, %2, %cst [1] : vector<32x64xf32> to vector<32xf32>
    %7 = vector.shape_cast %6 : vector<32xf32> to vector<32x1xf32>
    %cst_7 = arith.constant dense<0.000000e+00> : vector<32xf32>
    %8 = vector.multi_reduction <add>, %5, %cst_7 [1] : vector<32x64xf32> to vector<32xf32>
    %9 = vector.shape_cast %8 : vector<32xf32> to vector<32x1xf32>
    %10 = arith.addf %7, %9 : vector<32x1xf32>
    %11 = arith.mulf %2, %2 : vector<32x64xf32>
    %cst_8 = arith.constant dense<0.000000e+00> : vector<32xf32>
    %12 = vector.multi_reduction <add>, %11, %cst_8 [1] : vector<32x64xf32> to vector<32xf32>
    %13 = vector.shape_cast %12 : vector<32xf32> to vector<32x1xf32>
    %14 = arith.mulf %5, %5 : vector<32x64xf32>
    %cst_9 = arith.constant dense<0.000000e+00> : vector<32xf32>
    %15 = vector.multi_reduction <add>, %14, %cst_9 [1] : vector<32x64xf32> to vector<32xf32>
    %16 = vector.shape_cast %15 : vector<32xf32> to vector<32x1xf32>
    %17 = arith.addf %13, %16 : vector<32x1xf32>
    %cst_10 = arith.constant 7.812500e-03 : f32
    %18 = vector.broadcast %cst_10 : f32 to vector<32x1xf32>
    %19 = arith.mulf %10, %18 : vector<32x1xf32>
    %cst_11 = arith.constant 7.812500e-03 : f32
    %20 = vector.broadcast %cst_11 : f32 to vector<32x1xf32>
    %21 = arith.mulf %17, %20 : vector<32x1xf32>
    %22 = arith.mulf %19, %19 : vector<32x1xf32>
    %23 = arith.subf %21, %22 : vector<32x1xf32>
    %cst_12 = arith.constant 0.000000e+00 : f32
    %24 = vector.broadcast %cst_12 : f32 to vector<32x1xf32>
    %25 = arith.maximumf %23, %24 : vector<32x1xf32>
    %cst_13 = arith.constant 9.99999974E-6 : f32
    %26 = vector.broadcast %cst_13 : f32 to vector<32x1xf32>
    %27 = arith.addf %25, %26 : vector<32x1xf32>
    %28 = math.rsqrt %27 : vector<32x1xf32>
    %c0_14 = arith.constant 0 : index
    %c0_15 = arith.constant 0 : index
    %c0_16 = arith.constant 0 : index
    %29 = vector.load %arg3[%c0_14, %c0_15, %c0_16] : memref<2x64x64xf32, #tpu.memory_space<vmem>>, vector<1x64x64xf32>
    %30 = vector.shape_cast %29 : vector<1x64x64xf32> to vector<64x64xf32>
    %cst_17 = arith.constant dense<0.000000e+00> : vector<32x64xf32>
    %31 = tpu.matmul %2, %30, %cst_17 {dimension_numbers = #tpu.dot_dimension_numbers<[1], [0], [0], [1], [0, 0, 1, 1], [], []>} : vector<32x64xf32>, vector<64x64xf32>, vector<32x64xf32> -> vector<32x64xf32>
    %c1 = arith.constant 1 : index
    %c0_18 = arith.constant 0 : index
    %c0_19 = arith.constant 0 : index
    %32 = vector.load %arg3[%c1, %c0_18, %c0_19] : memref<2x64x64xf32, #tpu.memory_space<vmem>>, vector<1x64x64xf32>
    %33 = vector.shape_cast %32 : vector<1x64x64xf32> to vector<64x64xf32>
    %cst_20 = arith.constant dense<0.000000e+00> : vector<32x64xf32>
    %34 = tpu.matmul %5, %33, %cst_20 {dimension_numbers = #tpu.dot_dimension_numbers<[1], [0], [0], [1], [0, 0, 1, 1], [], []>} : vector<32x64xf32>, vector<64x64xf32>, vector<32x64xf32> -> vector<32x64xf32>
    %35 = arith.addf %31, %34 : vector<32x64xf32>
    %c0_21 = arith.constant 0 : index
    %c0_22 = arith.constant 0 : index
    %c0_23 = arith.constant 0 : index
    %36 = vector.load %arg4[%c0_21, %c0_22, %c0_23] : memref<2x1x64xf32, #tpu.memory_space<vmem>>, vector<1x1x64xf32>
    %37 = vector.shape_cast %36 : vector<1x1x64xf32> to vector<1x64xf32>
    %c1_24 = arith.constant 1 : index
    %c0_25 = arith.constant 0 : index
    %c0_26 = arith.constant 0 : index
    %38 = vector.load %arg4[%c1_24, %c0_25, %c0_26] : memref<2x1x64xf32, #tpu.memory_space<vmem>>, vector<1x1x64xf32>
    %39 = vector.shape_cast %38 : vector<1x1x64xf32> to vector<1x64xf32>
    %40 = arith.mulf %28, %19 : vector<32x1xf32>
    %41 = vector.broadcast %40 : vector<32x1xf32> to vector<32x64xf32>
    %42 = vector.broadcast %37 : vector<1x64xf32> to vector<32x64xf32>
    %43 = arith.mulf %41, %42 : vector<32x64xf32>
    %44 = vector.broadcast %39 : vector<1x64xf32> to vector<32x64xf32>
    %45 = arith.subf %44, %43 : vector<32x64xf32>
    %46 = vector.broadcast %28 : vector<32x1xf32> to vector<32x64xf32>
    %47 = arith.mulf %46, %35 : vector<32x64xf32>
    %48 = arith.addf %47, %45 : vector<32x64xf32>
    %49 = vector.shape_cast %48 : vector<32x64xf32> to vector<4x8x64xf32>
    %c0_27 = arith.constant 0 : index
    %c0_28 = arith.constant 0 : index
    %c0_29 = arith.constant 0 : index
    %50 = vector.load %arg5[%c0_27, %c0_28, %c0_29] : memref<4x8x64xf32, #tpu.memory_space<vmem>>, vector<4x8x64xf32>
    tpu.vector_store %arg5[%c0_27, %c0_28, %c0_29], %49 {strides = array<i32>} : memref<4x8x64xf32, #tpu.memory_space<vmem>>, vector<4x8x64xf32>,
    return
  }
  func.func @transform_0(%arg0: i32) -> (i32, i32, i32, i32) {
    %c0_i32 = arith.constant 0 : i32
    %c0_i32_0 = arith.constant 0 : i32
    %c0_i32_1 = arith.constant 0 : i32
    %c0_i32_2 = arith.constant 0 : i32
    return %arg0, %c0_i32, %c0_i32_0, %c0_i32_1 : i32, i32, i32, i32
  }
  func.func @transform_1(%arg0: i32) -> (i32, i32, i32, i32) {
    %c1_i32 = arith.constant 1 : i32
    %c0_i32 = arith.constant 0 : i32
    %c0_i32_0 = arith.constant 0 : i32
    %c0_i32_1 = arith.constant 0 : i32
    return %arg0, %c1_i32, %c0_i32, %c0_i32_0 : i32, i32, i32, i32
  }
  func.func @transform_2(%arg0: i32) -> (i32, i32, i32) {
    %c0_i32 = arith.constant 0 : i32
    %c0_i32_0 = arith.constant 0 : i32
    %c0_i32_1 = arith.constant 0 : i32
    %c0_i32_2 = arith.constant 0 : i32
    return %c0_i32, %c0_i32_0, %c0_i32_1 : i32, i32, i32
  }
  func.func @transform_3(%arg0: i32) -> (i32, i32, i32) {
    %c0_i32 = arith.constant 0 : i32
    %c0_i32_0 = arith.constant 0 : i32
    %c0_i32_1 = arith.constant 0 : i32
    %c0_i32_2 = arith.constant 0 : i32
    return %c0_i32, %c0_i32_0, %c0_i32_1 : i32, i32, i32
  }
  func.func @transform_4(%arg0: i32) -> (i32, i32, i32) {
    %c0_i32 = arith.constant 0 : i32
    %c0_i32_0 = arith.constant 0 : i32
    %c0_i32_1 = arith.constant 0 : i32
    return %arg0, %c0_i32, %c0_i32_0 : i32, i32, i32
  }
}

</mosaic_0001>

<bundles_post_ra>
// kernel: tpu_custom_call.1
= control target key start
LH: loop header
LB: loop body
LE: loop exit
PB: predicated region body
PF: predicated region fallthrough
CT: control target
= control target key end

     0   :  { %s1279_s0 = inlined_call_operand.hbm [shape: f32[16,2,8,64], index: 0, kind: input, shape index: {}]   ;;  %s1280_s1 = inlined_call_operand.hbm [shape: f32[16,2,8,64], index: 1, kind: input, shape index: {}]   ;;  %s1281_s2 = inlined_call_operand.hbm [shape: f32[2,64,64], index: 2, kind: input, shape index: {}]   ;;  %s1282_s3 = inlined_call_operand.vmem [shape: f32[2,1,64], index: 3, kind: input, shape index: {}]   ;;  %s1283_s4 = inlined_call_operand.hbm [shape: f32[16,8,64], index: 4, kind: output, shape index: {}]  }
   0x1   :  { %1289 = sst [smem:[#allocation15_spill]] %s1279_s0 }
   0x2   :  { %1290 = sst [smem:[#allocation16_spill]] %s1281_s2 }
   0x3   :  { %9 = vsyncpa [#allocation3], 0 }
   0x4   :  { %11 = vsyncpa [#allocation3 + $0x1], 0 }
   0x5   :  { %12 = vsyncpa [#allocation6], 0 }
   0x6   :  { %14 = vsyncpa [#allocation6 + $0x1], 0 }
   0x7   :  { %15 = vsyncpa [#allocation4], 0 }
   0x8   :  { %17 = vsyncpa [#allocation4 + $0x1], 0  ;;  %s998_s15 = smov 0   ;;  %s1000_s16 = smov 0  }
   0x9   :  { %s1002_s17 = smov 0   ;;  %s1004_s18 = smov 0  }
   0xa LB: > { %1291 = sst [smem:[#allocation13_spill]] %s961_s17  ;;  %s1019_s19 = sadd.s32 4294967295, %s965_s18   ;;  %s965_s18 = sphi %s1004_s18, %s1306_s18   ;;  %s961_s17 = sphi %s1002_s17, %s1303_s17   ;;  %s957_s16 = sphi %s1000_s16, %s1305_s16   ;;  %s953_s15 = sphi %s998_s15, %s1304_s15  }
   0xb   : > { %s674_s20 = sadd.s32 4294967294, %s965_s18   ;;  %p43_p0 = scmp.ne.s32.totalorder %s957_s16, %s953_s15 }
   0xc   : > { %p44_p1 = scmp.eq.s32.totalorder %s1019_s19, 0  ;;  %p135_p2 = scmp.eq.s32.totalorder %s1019_s19, 3 }
   0xd   : > { %p141_p3 = scmp.eq.s32.totalorder %s674_s20, 3  ;;  %p675_p5 = scmp.ge.s32.totalorder %s965_s18, 1 }
   0xe   : > { %p1028_p4 = por %p44_p1, %p43_p0  ;;  %p148_p7 = scmp.lt.s32.totalorder %s965_s18, 5 }
   0xf   : > { %p1033_p6 = por %p141_p3, %p43_p0  ;;  %s1294_s2 = sld [smem:[#allocation16_spill]] }
  0x10   : > { %p1041_p8 = pnand %p675_p5, %p148_p7  ;;  %s967_s27 = smov [#allocation7]  }
  0x11   : > { %s161_s28 = sshll.u32 %s967_s27, 4  ;;  %s1050_s29 = sadd.s32 1, %s965_s18   ;;  %s162_s28 = int_to_ptr.vmem [resolvable:$true] %s161_s28 }
  0x12   : > { %p734_p9 = pneg %p1041_p8  ;;  %s1284_s30 = smov 128  }
  0x13   : > { %s1286_s5 = smov 8   ;;  %s27_s6 = ssub.s32 %s965_s18, %s1050_s29 }
  0x14   : > { %p735_p10 = pnand %p734_p9, %p44_p1  ;;  %s30_s7 = sadd.s32 1, %s961_s17 }
  0x15   : > { %s159_s25 = sshll.u32 %s1294_s2, 4  ;;  %p28_p11 = scmp.eq.s32.totalorder %s27_s6, 0  ;;  %s160_s25 = int_to_ptr.hbm [resolvable:$true] %s159_s25 }
  0x16   : > { %737 = dma.hbm_to_vmem [thread:$0]  (!%p735_p10), %s160_s25, 2048, %s162_s28, [#allocation6], %s1284_s30, %s1284_s30, %s1286_s5  }
  0x17   : > { %p37_p12 = scmp.ne.s32.totalorder %s961_s17, %s957_s16  ;;  %p38_p13 = scmp.eq.s32.totalorder %s965_s18, 0 }
  0x18   : > { %p750_p0 = scmp.lt.s32.totalorder %s965_s18, 4  ;;  %s178_s10 = sand.u32 1, %s961_s17  }
  0x19   : > { %s1063_s8 = scalar_select %p28_p11, %s961_s17, %s30_s7  }
  0x1a   : > { %p39_p3 = por %p38_p13, %p37_p12  ;;  %p1067_p5 = por %p135_p2, %p37_p12 }
  0x1b   : > { %1296 = sst [smem:[#allocation14_spill]] %s1063_s8  ;;  %s705_s11 = sshll.u32 %s965_s18, 6 }
  0x1c   : > { %s1073_s12 = sshll.u32 %s178_s10, 5  ;;  %s1298_s0 = sld [smem:[#allocation15_spill]] }
  0x1d   : > { %s182_s24 = scalar_lea.vmem [#allocation2], %s1073_s12  ;;  %p1081_p7 = pnand %p750_p0, %p39_p3 }
  0x1e   : > { %s191_s25 = sshll.u32 %s182_s24, 4  ;;  %s607_s7 = scalar_lea.hbm %s1280_s1, %s705_s11  ;;  %s192_s25 = int_to_ptr.vmem [resolvable:$true] %s191_s25 }
  0x1f   : > { %s608_s30 = scalar_lea.hbm %s607_s7, 8  ;;  %s179_s13 = scalar_lea.sflag [#allocation3], %s178_s10 }
  0x20   : > { %p835_p9 = pneg %p1081_p7 }
  0x22   : > { %s188_s20 = scalar_lea.hbm %s1298_s0, %s705_s11  ;;  %s838_s2 = scalar_lea.hbm %s1298_s0, 256 }
  0x23   : > { %s189_s23 = sshll.u32 %s188_s20, 4  ;;  %s190_s23 = int_to_ptr.hbm [resolvable:$true] %s189_s23 }
  0x24   : > { %s831_s14 = sshra.s32 %s190_s23, 4  ;;  %s832_s14 = int_to_ptr.hbm [resolvable:$true] %s831_s14 }
  0x25   : > { %s833_s20 = scalar_lea.hbm %s832_s14, 32  ;;  %p839_p12 = scmp.lt.s32.totalorder %s832_s14, %s1298_s0 }
  0x26   : > { %p834_p2 = scmp.ne.s32.totalorder %s832_s14, %s833_s20  ;;  %p840_p13 = scmp.lt.s32.totalorder %s838_s2, %s833_s20 }
  0x28   : > { %p836_p10 = pnand %p835_p9, %p834_p2  ;;  %p841_p0 = por %p840_p13, %p839_p12 }
  0x2a   : > { %p837_p11 = pneg %p836_p10 }
  0x2c   : > { %p842_p3 = pnand %p841_p0, %p837_p11 }
  0x2e   : > { %845 = shalt.err (!%p842_p3)
}
  0x2f   : > { %s970_s10 = smov 256   ;;  %s1300_s11 = smov 8  }
  0x30   : > { %s1301_s7 = smov 128   ;;  %s213_s8 = sshll.u32 %s608_s30, 4  ;;  %s214_s8 = int_to_ptr.hbm [resolvable:$true] %s213_s8 }
  0x31   : > { %741 = dma.hbm_to_vmem [thread:$0]  (!%p1081_p7), %s190_s23, 512, %s192_s25, %s179_s13, %s970_s10, %s1301_s7, %s1300_s11  }
  0x32   : > { %s205_s5 = scalar_lea.vmem [#allocation5], %s1073_s12  ;;  %s201_s28 = sand.u32 1, %s965_s18  }
  0x33   : > { %s215_s24 = sshll.u32 %s205_s5, 4  ;;  %s202_s14 = scalar_lea.sflag [#allocation6], %s201_s28  ;;  %s216_s24 = int_to_ptr.vmem [resolvable:$true] %s215_s24 }
  0x34   : > { %s861_s2 = sshra.s32 %s214_s8, 4  ;;  %s868_s17 = scalar_lea.hbm %s1280_s1, 256  ;;  %s862_s2 = int_to_ptr.hbm [resolvable:$true] %s861_s2 }
  0x35   : > { %s863_s20 = scalar_lea.hbm %s862_s2, 32  ;;  %p869_p12 = scmp.lt.s32.totalorder %s862_s2, %s1280_s1 }
  0x36   : > { %p864_p2 = scmp.ne.s32.totalorder %s862_s2, %s863_s20  ;;  %p870_p13 = scmp.lt.s32.totalorder %s868_s17, %s863_s20 }
  0x38   : > { %p866_p10 = pnand %p864_p2, %p835_p9  ;;  %p871_p0 = por %p870_p13, %p869_p12 }
  0x3a   : > { %p867_p11 = pneg %p866_p10 }
  0x3c   : > { %p872_p3 = pnand %p871_p0, %p867_p11 }
  0x3e   : > { %875 = shalt.err (!%p872_p3)
}
  0x3f   : > { %744 = dma.hbm_to_vmem [thread:$0]  (!%p1081_p7), %s214_s8, 512, %s216_s24, %s202_s14, %s970_s10, %s1301_s7, %s1300_s11  }
  0x40   : > { %227 = sbr.rel (%p1041_p8) target bundleno = 274 (0x112), region = 36  ;;  %s1121_s0 = sand.u32 (!%p1041_p8), 1, %s957_s16  }
  0x41   : > { %s1124_s12 = sshll.u32 (!%p1041_p8), %s1121_s0, 5  ;;  %s230_s17 = scalar_lea.sflag (!%p1041_p8), [#allocation3], %s1121_s0 }
  0x42   : > { %s233_s25 = scalar_lea.vmem (!%p1041_p8), [#allocation2], %s1124_s12 }
  0x45   : > { %936 = dma.done.wait (%p1028_p4), %s230_s17, 512  }
  0x46   : > { %938 = vsyncadd (%p1028_p4), %s230_s17, 4294966784  ;;  %s239_s26 = sand.u32 1, %s1019_s19   ;;  %s1134_s27 = scalar_lea.vmem [#allocation5], %s1124_s12 }
  0x47   : > { %s240_s8 = scalar_lea.sflag [#allocation6], %s239_s26 }
  0x48   : > { %940 = dma.done.wait (%p1028_p4), %s240_s8, 512  }
  0x49   : > { %942 = vsyncadd (%p1028_p4), %s240_s8, 4294966784 }
  0x4a   : > { %944 = dma.done.wait (%p44_p1), [#allocation6], 2048  }
  0x4b   : > { %946 = vsyncadd (%p44_p1), [#allocation6], 4294965248  ;;  %vm290_vm0 = vcmask 523264   ;;  %v1145_v0 = vld [vmem:[%s1134_s27] sm:$0xff]  ;;  %v1147_v1 = vld [vmem:[%s233_s25 + $0x10] sm:$0xff]  ;;  %s707_s7 = sshll.u32 %s1019_s19, 5 }
  0x4c   : > { %v1149_v2 = vld [vmem:[%s233_s25] sm:$0xff]  ;;  %v303_v3 = vsel %vm290_vm0, %v1145_v0, 0.0  ;;  %v297_v4 = vsel %vm290_vm0, %v1147_v1, 0.0  ;;  %v435_v6 = vld [vmem:[#allocation7 + $0x78] sm:$0xff]  ;;  %v434_v8 = vld [vmem:[#allocation7 + $0x70] sm:$0xff]  ;;  %v321_v34 = vmul.f32 %v1147_v1, %v1147_v1  ;;  %v335_v42 = vmul.f32 %v1145_v0, %v1145_v0  ;;  %s278_s5 = scalar_lea.vmem [#allocation8], %s1124_s12  ;;  %s563_s14 = scalar_lea.hbm %s1283_s4, %s707_s7 }
  0x4d   : > { %v291_v5 = vsel %vm290_vm0, %v1149_v2, 0.0  ;;  %304 = vadd.xlane.f32.xlu2 %v303_v3  ;;  %298 = vadd.xlane.f32.xlu1 %v297_v4  ;;  %v426_v7 = vld [vmem:[#allocation7 + $0x38] sm:$0xff]  ;;  %v425_v9 = vld [vmem:[#allocation7 + $0x30] sm:$0xff]  ;;  %v1158_v10 = vld [vmem:[%s1134_s27 + $0x8] sm:$0xff]  ;;  %v319_v22 = vmul.f32 %v1149_v2, %v1149_v2  ;;  %s564_s19 = sshll.u32 %s278_s5, 4  ;;  %s566_s2 = sshll.u32 %s563_s14, 4  ;;  %s565_s19 = int_to_ptr.vmem [resolvable:$true] %s564_s19  ;;  %s567_s2 = int_to_ptr.hbm [resolvable:$true] %s566_s2 }
  0x4e   : > { %292 = vadd.xlane.f32.xlu0 %v291_v5  ;;  %456 = vmatpush.msra.mxu0 %v435_v6  ;;  %v1160_v11 = vld [vmem:[%s233_s25 + $0x18] sm:$0xff]  ;;  %v433_v12 = vld [vmem:[#allocation7 + $0x68] sm:$0xff]  ;;  %v432_v15 = vld [vmem:[#allocation7 + $0x60] sm:$0xff]  ;;  %v306_v16 = vsel %vm290_vm0, %v1158_v10, 0.0  ;;  %v329_v37 = vsel %vm290_vm0, %v321_v34, 0.0  ;;  %v336_v40 = vmul.f32 %v1158_v10, %v1158_v10  ;;  %v339_v45 = vsel %vm290_vm0, %v335_v42, 0.0 }
  0x4f   : > { %497 = vmatpush.msra.mxu1 %v426_v7  ;;  %708 = vmatpush.msra.mxu2 %v435_v6  ;;  %v1162_v13 = vld [vmem:[%s233_s25 + $0x8] sm:$0xff]  ;;  %v300_v17 = vsel %vm290_vm0, %v1160_v11, 0.0  ;;  %v423_v19 = vld [vmem:[#allocation7 + $0x20] sm:$0xff]  ;;  %v431_v20 = vld [vmem:[#allocation7 + $0x58] sm:$0xff]  ;;  %v323_v30 = vsel %vm290_vm0, %v319_v22, 0.0  ;;  %v322_v35 = vmul.f32 %v1160_v11, %v1160_v11  ;;  %s552_s20 = scalar_lea.sflag [#allocation4], %s1121_s0 }
  0x50   : > { %457 = vmatpush.msra.mxu0 %v434_v8  ;;  %716 = vmatpush.msra.mxu3 %v426_v7  ;;  %v424_v14 = vld [vmem:[#allocation7 + $0x28] sm:$0xff]  ;;  %v294_v18 = vsel %vm290_vm0, %v1162_v13, 0.0  ;;  %v422_v21 = vld [vmem:[#allocation7 + $0x18] sm:$0xff]  ;;  %v430_v23 = vld [vmem:[#allocation7 + $0x50] sm:$0xff]  ;;  %v320_v36 = vmul.f32 %v1162_v13, %v1162_v13  ;;  %v342_v43 = vsel %vm290_vm0, %v336_v40, 0.0  ;;  %s905_s6 = sshra.s32 %s567_s2, 4  ;;  %s906_s6 = int_to_ptr.hbm [resolvable:$true] %s905_s6 }
  0x51   : > { %498 = vmatpush.msra.mxu1 %v425_v9  ;;  %709 = vmatpush.msra.mxu2 %v434_v8  ;;  %v289_v24 = vld [vmem:[%s1134_s27 + $0x18] sm:$0xff]  ;;  %v421_v25 = vld [vmem:[#allocation7 + $0x10] sm:$0xff]  ;;  %v429_v27 = vld [vmem:[#allocation7 + $0x48] sm:$0xff]  ;;  %v332_v38 = vsel %vm290_vm0, %v322_v35, 0.0  ;;  %s907_s23 = scalar_lea.hbm %s906_s6, 32  ;;  %s911_s17 = scalar_lea.hbm %s1283_s4, 128 }
  0x52   : > { %458 = vmatpush.msra.mxu0 %v433_v12  ;;  %717 = vmatpush.msra.mxu3 %v425_v9  ;;  %v288_v26 = vld [vmem:[%s1134_s27 + $0x10] sm:$0xff]  ;;  %v420_v28 = vld [vmem:[#allocation7 + $0x8] sm:$0xff]  ;;  %v312_v29 = vsel %vm290_vm0, %v289_v24, 0.0  ;;  %v428_v32 = vld [vmem:[#allocation7 + $0x40] sm:$0xff]  ;;  %v326_v39 = vsel %vm290_vm0, %v320_v36, 0.0  ;;  %v338_v46 = vmul.f32 %v289_v24, %v289_v24  ;;  %p908_p1 = scmp.ne.s32.totalorder %s906_s6, %s907_s23  ;;  %p912_p7 = scmp.lt.s32.totalorder %s906_s6, %s1283_s4 }
  0x53   : > { %499 = vmatpush.msra.mxu1 %v424_v14  ;;  %710 = vmatpush.msra.mxu2 %v433_v12  ;;  %v309_v31 = vsel %vm290_vm0, %v288_v26, 0.0  ;;  %v419_v33 = vld [vmem:[#allocation7] sm:$0xff]  ;;  %v337_v41 = vmul.f32 %v288_v26, %v288_v26  ;;  %p913_p9 = scmp.lt.s32.totalorder %s911_s17, %s907_s23 }
  0x54   : > { %459 = vmatpush.msra.mxu0 %v432_v15  ;;  %718 = vmatpush.msra.mxu3 %v424_v14  ;;  %v348_v47 = vsel %vm290_vm0, %v338_v46, 0.0  ;;  %p909_p4 = pnand %p908_p1, %p1067_p5 }
  0x55   : > { %307 = vadd.xlane.f32.xlu2 %v306_v16  ;;  %301 = vadd.xlane.f32.xlu1 %v300_v17  ;;  %v345_v44 = vsel %vm290_vm0, %v337_v41, 0.0  ;;  %p914_p2 = por %p913_p9, %p912_p7 }
  0x56   : > { %295 = vadd.xlane.f32.xlu0 %v294_v18  ;;  %500 = vmatpush.msra.mxu1 %v423_v19  ;;  %p910_p8 = pneg %p909_p4 }
  0x57   : > { %711 = vmatpush.msra.mxu2 %v432_v15  ;;  %460 = vmatpush.msra.mxu0 %v431_v20 }
  0x58   : > { %719 = vmatpush.msra.mxu3 %v423_v19  ;;  %501 = vmatpush.msra.mxu1 %v422_v21  ;;  %p915_p10 = pnand %p914_p2, %p910_p8 }
  0x59   : > { %712 = vmatpush.msra.mxu2 %v431_v20  ;;  %461 = vmatpush.msra.mxu0 %v430_v23 }
  0x5a   : > { %720 = vmatpush.msra.mxu3 %v422_v21  ;;  %502 = vmatpush.msra.mxu1 %v421_v25 }
  0x5b   : > { %713 = vmatpush.msra.mxu2 %v430_v23  ;;  %462 = vmatpush.msra.mxu0 %v429_v27 }
  0x5c   : > { %721 = vmatpush.msra.mxu3 %v421_v25  ;;  %503 = vmatpush.msra.mxu1 %v420_v28 }
  0x5d   : > { %313 = vadd.xlane.f32.xlu1 %v312_v29  ;;  %324 = vadd.xlane.f32.xlu2 %v323_v30 }
  0x5e   : > { %310 = vadd.xlane.f32.xlu0 %v309_v31  ;;  %714 = vmatpush.msra.mxu2 %v429_v27 }
  0x5f   : > { %463 = vmatpush.msra.mxu0 %v428_v32  ;;  %722 = vmatpush.msra.mxu3 %v420_v28 }
  0x60   : > { %504 = vmatpush.msra.mxu1 %v419_v33  ;;  %690 = vmatmul.msk.f32.vlgmr.msra.gmra.mxu0 %vm290_vm0, %v1145_v0 }
  0x61   : > { %694 = vmatmul.msk.f32.vlgmr.msra.gmra.mxu1 %vm290_vm0, %v1149_v2  ;;  %715 = vmatpush.msra.mxu2 %v428_v32 }
  0x62   : > { %723 = vmatpush.msra.mxu3 %v419_v33  ;;  %692 = vmatmul.msk.f32.vlgmr.msra.gmra.mxu2 %vm290_vm0, %v288_v26 }
  0x63   : > { %696 = vmatmul.msk.f32.vlgmr.msra.gmra.mxu3 %vm290_vm0, %v1147_v1 }
  0x65   : > { %330 = vadd.xlane.f32.xlu1 %v329_v37  ;;  %333 = vadd.xlane.f32.xlu2 %v332_v38 }
  0x66   : > { %327 = vadd.xlane.f32.xlu0 %v326_v39 }
  0x68   : > { %691 = vmatmul.msk.f32.gmra.mxu0 %vm290_vm0, %v1158_v10 }
  0x69   : > { %695 = vmatmul.msk.f32.gmra.mxu1 %vm290_vm0, %v1162_v13 }
  0x6a   : > { %693 = vmatmul.msk.f32.gmra.mxu2 %vm290_vm0, %v289_v24 }
  0x6b   : > { %697 = vmatmul.msk.f32.gmra.mxu3 %vm290_vm0, %v1160_v11 }
  0x6d   : > { %343 = vadd.xlane.f32.xlu1 %v342_v43  ;;  %346 = vadd.xlane.f32.xlu2 %v345_v44 }
  0x6e   : > { %340 = vadd.xlane.f32.xlu0 %v339_v45 }
  0x76   : > { %349 = vadd.xlane.f32.xlu0 %v348_v47 }
  0xc0   : > { %v305_v48 = vpop.xlane.xlu2 %304  ;;  %v299_v49 = vpop.xlane.xlu1 %298 }
  0xc1   : > { %v293_v50 = vpop.xlane.xlu0 %292 }
  0xc2   : > { %v315_v62 = vadd.f32 %v305_v48, %v293_v50 }
  0xc4   : > { %v1212_v1 = vmul.f32 0.0078125, %v315_v62 }
  0xc6   : > { %v363_v12 = vmul.f32 %v1212_v1, %v1212_v1 }
  0xc8   : > { %v308_v51 = vpop.xlane.xlu2 %307  ;;  %v302_v52 = vpop.xlane.xlu1 %301 }
  0xc9   : > { %v296_v53 = vpop.xlane.xlu0 %295 }
  0xca   : > { %v316_v60 = vadd.f32 %v308_v51, %v296_v53 }
  0xcc   : > { %v1208_v63 = vmul.f32 0.0078125, %v316_v60 }
  0xce   : > { %v364_v8 = vmul.f32 %v1208_v63, %v1208_v63 }
  0xd0   : > { %v314_v54 = vpop.xlane.xlu1 %313  ;;  %v325_v55 = vpop.xlane.xlu2 %324 }
  0xd1   : > { %v311_v56 = vpop.xlane.xlu0 %310  ;;  %v318_v13 = vadd.f32 %v314_v54, %v302_v52 }
  0xd2   : > { %v317_v61 = vadd.f32 %v311_v56, %v299_v49  ;;  %v791_v56 = vld [vmem:[%s1282_s3] ss:$0 sm:$0xff] }
  0xd3   : > { %v1220_v20 = vmul.f32 0.0078125, %v318_v13 }
  0xd4   : > { %v1210_v0 = vmul.f32 0.0078125, %v317_v61  ;;  %v792_v61 = vld [vmem:[%s1282_s3 + $0x1] ss:$0 sm:$0xff] }
  0xd5   : > { %v366_v27 = vmul.f32 %v1220_v20, %v1220_v20 }
  0xd6   : > { %v365_v9 = vmul.f32 %v1210_v0, %v1210_v0 }
  0xd8   : > { %v331_v57 = vpop.xlane.xlu1 %330  ;;  %v334_v58 = vpop.xlane.xlu2 %333 }
  0xd9   : > { %v328_v59 = vpop.xlane.xlu0 %327 }
  0xdd   : > { %v465_v31 = vpop.f32.mrf.mxu0 }
  0xde   : > { %v506_v32 = vpop.f32.mrf.mxu1 }
  0xe0   : > { %v344_v2 = vpop.xlane.xlu1 %343  ;;  %v347_v3 = vpop.xlane.xlu2 %346 }
  0xe1   : > { %v352_v4 = vadd.f32 %v344_v2, %v328_v59  ;;  %v353_v5 = vadd.f32 %v347_v3, %v331_v57  ;;  %v341_v6 = vpop.xlane.xlu0 %340 }
  0xe2   : > { %v351_v7 = vadd.f32 %v341_v6, %v325_v55 }
  0xe3   : > { %v360_v10 = vmul.f32 0.0078125, %v352_v4  ;;  %v361_v11 = vmul.f32 0.0078125, %v353_v5 }
  0xe4   : > { %v359_v14 = vmul.f32 0.0078125, %v351_v7  ;;  %v507_v7 = vadd.f32 %v506_v32, %v465_v31 }
  0xe5   : > { %v368_v15 = vsub.f32 %v360_v10, %v364_v8  ;;  %v369_v16 = vsub.f32 %v361_v11, %v365_v9  ;;  %v471_v47 = vpop.f32.mrf.mxu2  ;;  %v468_v52 = vpop.f32.mrf.mxu0 }
  0xe6   : > { %v367_v17 = vsub.f32 %v359_v14, %v363_v12  ;;  %v512_v49 = vpop.f32.mrf.mxu3  ;;  %v509_v54 = vpop.f32.mrf.mxu1 }
  0xe7   : > { %v372_v18 = vmax.f32 %v368_v15, 0.0  ;;  %v373_v19 = vmax.f32 %v369_v16, 0.0  ;;  %v510_v62 = vadd.f32 %v509_v54, %v468_v52  ;;  %v513_v5 = vadd.f32 %v512_v49, %v471_v47 }
  0xe8   : > { %v371_v21 = vmax.f32 %v367_v17, 0.0 }
  0xe9   : > { %v376_v22 = vadd.f32 1e-05, %v372_v18  ;;  %v377_v23 = vadd.f32 1e-05, %v373_v19  ;;  %v350_v24 = vpop.xlane.xlu0 %349 }
  0xea   : > { %v375_v25 = vadd.f32 1e-05, %v371_v21  ;;  %v354_v26 = vadd.f32 %v350_v24, %v334_v58 }
  0xeb   : > { %793 = vrsqrt.f32 %v376_v22  ;;  %vm395_vm4 = vweird.f32 %v376_v22  ;;  %vm405_vm6 = vweird.f32 %v377_v23 }
  0xec   : > { %795 = vrsqrt.f32 %v377_v23  ;;  %v362_v28 = vmul.f32 0.0078125, %v354_v26  ;;  %vm385_vm7 = vweird.f32 %v375_v25 }
  0xed   : > { %797 = vrsqrt.f32 %v375_v25  ;;  %v474_v19 = vpop.f32.mrf.mxu2 }
  0xee   : > { %v370_v29 = vsub.f32 %v362_v28, %v366_v27 }
  0xf0   : > { %v374_v30 = vmax.f32 %v370_v29, 0.0 }
  0xf1   : > { %v794_v33 = vpop.eup %793 }
  0xf2   : > { %v796_v34 = vpop.eup %795  ;;  %v390_v35 = vmul.f32 %v794_v33, %v376_v22  ;;  %v1224_v36 = vadd.f32 1e-05, %v374_v30  ;;  %vm396_vm1 = vweird.f32 %v794_v33 }
  0xf3   : > { %v798_v37 = vpop.eup %797  ;;  %v400_v38 = vmul.f32 %v796_v34, %v377_v23  ;;  %vm406_vm2 = vweird.f32 %v796_v34  ;;  %vm397_vm5 = vmor %vm395_vm4, %vm396_vm1 }
  0xf4   : > { %v391_v39 = vmul.f32 %v794_v33, %v390_v35  ;;  %v380_v40 = vmul.f32 %v798_v37, %v375_v25  ;;  %799 = vrsqrt.f32 %v1224_v36  ;;  %vm386_vm3 = vweird.f32 %v798_v37  ;;  %vm407_vm8 = vmor %vm405_vm6, %vm406_vm2 }
  0xf5   : > { %v401_v41 = vmul.f32 %v796_v34, %v400_v38  ;;  %vm387_vm9 = vmor %vm385_vm7, %vm386_vm3  ;;  %vm415_vm11 = vweird.f32 %v1224_v36 }
  0xf6   : > { %v381_v42 = vmul.f32 %v798_v37, %v380_v40  ;;  %v392_v43 = vmul.f32 0.5, %v391_v39 }
  0xf7   : > { %v402_v44 = vmul.f32 0.5, %v401_v41 }
  0xf8   : > { %v382_v45 = vmul.f32 0.5, %v381_v42  ;;  %v393_v46 = vsub.f32 1.5, %v392_v43 }
  0xf9   : > { %v403_v48 = vsub.f32 1.5, %v402_v44 }
  0xfa   : > { %v800_v50 = vpop.eup %799  ;;  %v383_v51 = vsub.f32 1.5, %v382_v45  ;;  %v394_v53 = vmul.f32 %v794_v33, %v393_v46 }
  0xfb   : > { %v410_v55 = vmul.f32 %v800_v50, %v1224_v36  ;;  %v404_v57 = vmul.f32 %v796_v34, %v403_v48  ;;  %vm416_vm10 = vweird.f32 %v800_v50 }
  0xfc   : > { %v384_v58 = vmul.f32 %v798_v37, %v383_v51  ;;  %v398_v59 = vsel %vm397_vm5, %v794_v33, %v394_v53  ;;  %vm417_vm12 = vmor %vm415_vm11, %vm416_vm10 }
  0xfd   : > { %v411_v60 = vmul.f32 %v800_v50, %v410_v55  ;;  %v522_v2 = vmul.f32 %v398_v59, %v1208_v63  ;;  %v408_v3 = vsel %vm407_vm8, %v796_v34, %v404_v57  ;;  %v540_v14 = vmul.f32 %v510_v62, %v398_v59 }
  0xfe   : > { %v388_v4 = vsel %vm387_vm9, %v798_v37, %v384_v58  ;;  %v523_v6 = vmul.f32 %v408_v3, %v1210_v0  ;;  %v541_v63 = vmul.f32 %v513_v5, %v408_v3 }
  0xff   : > { %v521_v8 = vmul.f32 %v388_v4, %v1212_v1  ;;  %v529_v9 = vmul.f32 %v791_v56, %v522_v2  ;;  %v412_v10 = vmul.f32 0.5, %v411_v60  ;;  %v539_v18 = vmul.f32 %v507_v7, %v388_v4  ;;  %v515_v1 = vpop.f32.mrf.mxu3 }
 0x100   : > { %v530_v11 = vmul.f32 %v791_v56, %v523_v6  ;;  %v516_v25 = vadd.f32 %v515_v1, %v474_v19 }
 0x101   : > { %v528_v12 = vmul.f32 %v791_v56, %v521_v8  ;;  %v536_v13 = vsub.f32 %v792_v61, %v529_v9  ;;  %v413_v15 = vsub.f32 1.5, %v412_v10 }
 0x102   : > { %v537_v16 = vsub.f32 %v792_v61, %v530_v11 }
 0x103   : > { %v535_v17 = vsub.f32 %v792_v61, %v528_v12  ;;  %v544_v0 = vadd.f32 %v540_v14, %v536_v13  ;;  %v414_v21 = vmul.f32 %v800_v50, %v413_v15 }
 0x104   : > { %v545_v22 = vadd.f32 %v541_v63, %v537_v16 }
 0x105   : > { %v543_v23 = vadd.f32 %v539_v18, %v535_v17  ;;  %548 = vst.msk [vmem:[%s278_s5 + $0x8] sm:$0xff] %vm290_vm0, %v544_v0  ;;  %v418_v24 = vsel %vm417_vm12, %v800_v50, %v414_v21 }
 0x106   : > { %549 = vst.msk [vmem:[%s278_s5 + $0x10] sm:$0xff] %vm290_vm0, %v545_v22  ;;  %v524_v26 = vmul.f32 %v418_v24, %v1220_v20  ;;  %v542_v29 = vmul.f32 %v516_v25, %v418_v24 }
 0x107   : > { %547 = vst.msk [vmem:[%s278_s5] sm:$0xff] %vm290_vm0, %v543_v23 }
 0x108   : > { %v531_v27 = vmul.f32 %v791_v56, %v524_v26 }
 0x10a   : > { %v538_v28 = vsub.f32 %v792_v61, %v531_v27 }
 0x10c   : > { %v546_v30 = vadd.f32 %v542_v29, %v538_v28 }
 0x10e   : > { %550 = vst.msk [vmem:[%s278_s5 + $0x18] sm:$0xff] %vm290_vm0, %v546_v30 }
 0x10f   : > { %918 = shalt.err (!%p915_p10)
}
 0x110   : > { %s971_s0 = smov 128   ;;  %s972_s8 = smov 8  }
 0x111   : > { %732 = dma.vmem_to_hbm [thread:$0]  (%p1067_p5), %s565_s19, 512, %s567_s2, %s552_s20, %s971_s0, %s971_s0, %s972_s8  }
 0x112 PF: > { %p752_p11 = scmp.ge.s32.totalorder %s965_s18, 2  ;;  %s581_s27 = sand.u32 1, %s953_s15  }
 0x113   : > { %s582_s21 = scalar_lea.sflag [#allocation4], %s581_s27 }
 0x114   : > { %p746_p12 = pnand %p752_p11, %p1033_p6 }
 0x116   : > { %p747_p13 = pneg %p746_p12 }
 0x118   : > { %948 = dma.done.wait (%p747_p13), %s582_s21, 512  }
 0x119   : > { %950 = vsyncadd (%p747_p13), %s582_s21, 4294966784  ;;  %s1302_s13 = sld [smem:[#allocation13_spill]]  ;;  %p20_p0 = scmp.ge.s32.totalorder %s1050_s29, 6  }
 0x11a   : > { %s1303_s17 = sld [smem:[#allocation14_spill]]  ;;  %s1304_s15 = smov %s957_s16 }
 0x11b   : > { %s1306_s18 = smov %s1050_s29  ;;  %22 = sbr.rel (!%p20_p0) target bundleno = 10 (0xa), region = 100 }
 0x11f   : > { %s1305_s16 = smov %s1302_s13 }
 0x120   :  { %588 = vsyncpa [#allocation3], 1 }
 0x121   :  { %590 = vsyncpa [#allocation3 + $0x1], 1 }
 0x122   :  { %591 = vsyncpa [#allocation6], 1 }
 0x123   :  { %593 = vsyncpa [#allocation6 + $0x1], 1 }
 0x124   :  { %594 = vsyncpa [#allocation4], 1 }
 0x125   :  { %596 = vsyncpa [#allocation4 + $0x1], 1 }

</bundles_post_ra>
